<compile_context>
chip_gen: v5e
topology: v5e:2x2
jax: 0.10.0
libtpu: 0.0.40
codegen_flags: <defaults>
</compile_context>

<pallas_src>
import numpy as np
import jax
import jax.numpy as jnp
from jax.experimental import pallas as pl
from jax.experimental.pallas import tpu as pltpu


def _round_up(v, m):
    return ((v + m - 1) // m) * m


def _round_down(v, m):
    return (v // m) * m


def _vgae_decoder_kernel(x_ref, w1_ref, b1_ref, w2_ref, b2_ref, o_ref):
    # x_ref:  (tm, in_c)        f32 node-feature tile
    # w1_ref: (in_c, hid_pad)   compute-dtype weight (Linear 1, resident)
    # b1_ref: (1, hid_pad)      f32 bias (zero-padded)
    # w2_ref: (hid_pad, out_c)  compute-dtype weight (Linear 2, resident)
    # b2_ref: (1, out_c)        f32 bias
    # o_ref:  (tm, out_c)       output tile
    x = x_ref[...].astype(w1_ref.dtype)          # VPU cast, hidden under the x DMA
    h = jnp.dot(x, w1_ref[...], preferred_element_type=jnp.float32)
    h = jnp.maximum(h + b1_ref[...], 0.0)        # bias + ReLU in f32
    y = jnp.dot(h.astype(w2_ref.dtype), w2_ref[...],
                preferred_element_type=jnp.float32)
    o_ref[...] = (y + b2_ref[...]).astype(o_ref.dtype)


def prepare_decoder_params(w1, b1, w2, b2, *, compute_dtype=jnp.bfloat16):
    """One-time parameter prep (keep this OUTSIDE the per-call path).

    * hid zero-padded up to a multiple of 128 so the intermediate h is
      lane-dense (exact through ReLU and the second matmul),
    * weights cast once to the MXU compute dtype, biases kept in f32 as (1, C).
    """
    in_c, hid = w1.shape
    out_c = w2.shape[1]
    hid_pad = _round_up(hid, 128)
    if hid_pad != hid:
        w1 = jnp.pad(w1, ((0, 0), (0, hid_pad - hid)))
        b1 = jnp.pad(b1, ((0, hid_pad - hid),))
        w2 = jnp.pad(w2, ((0, hid_pad - hid), (0, 0)))
    return (w1.astype(compute_dtype),
            b1.reshape(1, hid_pad).astype(jnp.float32),
            w2.astype(compute_dtype),
            b2.reshape(1, out_c).astype(jnp.float32))


def vgae_decoder_forward(x, edge_index, params, *, tm=4096, out_dtype=jnp.float32):
    """x: [N, in_c] float32, params from prepare_decoder_params.
    Returns [N, out_c] in out_dtype (float32 by default, matching the module)."""
    del edge_index  # unused by the reference forward pass
    w1, b1, w2, b2 = params
    N, in_c = x.shape
    hid_pad = w1.shape[1]
    out_c = w2.shape[1]
    out_bytes = np.dtype(out_dtype).itemsize

    # Row tile: as big as possible (amortize per-grid-step fixed cost), capped
    # only by N (rounded to a sublane multiple) and a conservative VMEM budget
    # that stays under every chip's default scoped limit.
    row_bytes = 2 * in_c * 4 + 2 * out_c * out_bytes + hid_pad * 4  # 2x x/out bufs + h
    tm_vmem_cap = max(8, _round_down((10 << 20) // row_bytes, 8))
    tm_eff = min(max(8, _round_down(tm, 8)), _round_up(N, 8), tm_vmem_cap)
    grid_len = pl.cdiv(N, tm_eff)

    # Grid-invariant weights: single-buffer them and raise the scoped-VMEM limit
    # only when they are big enough to matter (inert at the demo sizes).
    weight_bytes = w1.size * w1.dtype.itemsize + w2.size * w2.dtype.itemsize
    w_kwargs = dict(pipeline_mode=pl.Buffered(1)) if weight_bytes > (4 << 20) else {}
    n_wbuf = 1 if w_kwargs else 2
    vmem_est = tm_eff * row_bytes + n_wbuf * weight_bytes + 2 * (hid_pad + out_c) * 4
    compiler_kwargs = dict(dimension_semantics=("parallel",))
    if vmem_est > (12 << 20):
        compiler_kwargs["vmem_limit_bytes"] = min(vmem_est + (8 << 20), 64 << 20)

    flops = 2 * N * (in_c * hid_pad + hid_pad * out_c)
    bytes_accessed = (N * in_c * 4                      # x (f32, read once)
                      + weight_bytes                    # resident weights
                      + (hid_pad + out_c) * 4           # biases (f32)
                      + N * out_c * out_bytes)          # output

    return pl.pallas_call(
        _vgae_decoder_kernel,
        out_shape=jax.ShapeDtypeStruct((N, out_c), out_dtype),
        grid_spec=pltpu.PrefetchScalarGridSpec(
            num_scalar_prefetch=0,
            grid=(grid_len,),
            in_specs=[
                pl.BlockSpec((tm_eff, in_c), lambda i: (i, 0)),               # x tile (f32)
                pl.BlockSpec((in_c, hid_pad), lambda i: (0, 0), **w_kwargs),  # W1 (resident)
                pl.BlockSpec((1, hid_pad), lambda i: (0, 0)),                 # b1
                pl.BlockSpec((hid_pad, out_c), lambda i: (0, 0), **w_kwargs), # W2 (resident)
                pl.BlockSpec((1, out_c), lambda i: (0, 0)),                   # b2
            ],
            out_specs=pl.BlockSpec((tm_eff, out_c), lambda i: (i, 0)),
        ),
        compiler_params=pltpu.CompilerParams(**compiler_kwargs),
        cost_estimate=pl.CostEstimate(
            flops=flops, transcendentals=0, bytes_accessed=bytes_accessed),
    )(x, w1, b1, w2, b2)


def init_params(key, in_channels, out_channels):
    """Parameter shapes match the torch module; weights are kept pre-transposed
    as [in_features, out_features] for the kernel."""
    hid = 2 * in_channels
    k1, k2, k3, k4 = jax.random.split(key, 4)
    bound1 = 1.0 / jnp.sqrt(in_channels)
    bound2 = 1.0 / jnp.sqrt(hid)
    w1 = jax.random.uniform(k1, (in_channels, hid), jnp.float32, -bound1, bound1)
    b1 = jax.random.uniform(k2, (hid,), jnp.float32, -bound1, bound1)
    w2 = jax.random.uniform(k3, (hid, out_channels), jnp.float32, -bound2, bound2)
    b2 = jax.random.uniform(k4, (out_channels,), jnp.float32, -bound2, bound2)
    return w1, b1, w2, b2


if __name__ == "__main__":
    key = jax.random.PRNGKey(0)
    kx, kp, ke = jax.random.split(key, 3)

    N = 128            # number of nodes
    in_channels = 32
    out_channels = 16

    x = jax.random.normal(kx, (N, in_channels), jnp.float32)
    # edge_index is unused by the forward pass; built for signature parity.
    edge_index = jax.random.randint(ke, (2, 256), 0, N, dtype=jnp.int32)

    w1, b1, w2, b2 = init_params(kp, in_channels, out_channels)

    # --- default bf16 (perf) path: compare against a bf16-matched JAX reference.
    params_bf16 = prepare_decoder_params(w1, b1, w2, b2, compute_dtype=jnp.bfloat16)
    out = jax.block_until_ready(vgae_decoder_forward(x, edge_index, params_bf16))

    xb = x.astype(jnp.bfloat16)
    h_ref = jnp.maximum(
        jnp.dot(xb, w1.astype(jnp.bfloat16), preferred_element_type=jnp.float32) + b1, 0.0)
    ref_bf16 = jnp.dot(h_ref.astype(jnp.bfloat16), w2.astype(jnp.bfloat16),
                       preferred_element_type=jnp.float32) + b2
    assert out.shape == (N, out_channels)
    assert jnp.allclose(out, ref_bf16, atol=1e-2, rtol=1e-2), "bf16 path mismatch"

    # --- f32 fallback path: checks the full-precision accuracy budget against
    # the torch-semantics reference (addresses the bf16-drift concern).
    params_f32 = prepare_decoder_params(w1, b1, w2, b2, compute_dtype=jnp.float32)
    out_f32 = jax.block_until_ready(vgae_decoder_forward(x, edge_index, params_f32))
    ref_f32 = jnp.maximum(x @ w1 + b1, 0.0) @ w2 + b2
    assert jnp.allclose(out_f32, ref_f32, atol=1e-3, rtol=1e-3), "f32 path mismatch"

    print("KERNEL_OK")
</pallas_src>

<mosaic_0001>
module attributes {stable_mosaic.version = 11 : i64} {
  func.func @_vgae_decoder_kernel(%arg0: i32, %arg1: memref<128x32xf32, #tpu.memory_space<vmem>>, %arg2: memref<32x128xbf16, #tpu.memory_space<vmem>>, %arg3: memref<1x128xf32, #tpu.memory_space<vmem>>, %arg4: memref<128x16xbf16, #tpu.memory_space<vmem>>, %arg5: memref<1x16xf32, #tpu.memory_space<vmem>>, %arg6: memref<128x16xf32, #tpu.memory_space<vmem>>) attributes {dimension_semantics = [#tpu.dimension_semantics<parallel>], iteration_bounds = array<i64: 1>, scalar_prefetch = 0 : i64, scratch_operands = 0 : i64, tpu.core_type = #tpu.core_type<tc>, window_params = [{transform_indices = @transform_0, window_bounds = array<i64: 128, 32>}, {pipeline_mode = #tpu.pipeline_mode<synchronous>, transform_indices = @transform_1, window_bounds = array<i64: 32, 128>}, {pipeline_mode = #tpu.pipeline_mode<synchronous>, transform_indices = @transform_2, window_bounds = array<i64: 1, 128>}, {pipeline_mode = #tpu.pipeline_mode<synchronous>, transform_indices = @transform_3, window_bounds = array<i64: 128, 16>}, {pipeline_mode = #tpu.pipeline_mode<synchronous>, transform_indices = @transform_4, window_bounds = array<i64: 1, 16>}, {transform_indices = @transform_5, window_bounds = array<i64: 128, 16>}]} {
    %c0 = arith.constant 0 : index
    %c0_0 = arith.constant 0 : index
    %0 = vector.load %arg1[%c0, %c0_0] : memref<128x32xf32, #tpu.memory_space<vmem>>, vector<128x32xf32>
    %1 = arith.truncf %0 : vector<128x32xf32> to vector<128x32xbf16>
    %c0_1 = arith.constant 0 : index
    %c0_2 = arith.constant 0 : index
    %2 = vector.load %arg2[%c0_1, %c0_2] : memref<32x128xbf16, #tpu.memory_space<vmem>>, vector<32x128xbf16>
    %cst = arith.constant dense<0.000000e+00> : vector<128x128xf32>
    %3 = tpu.matmul %1, %2, %cst {dimension_numbers = #tpu.dot_dimension_numbers<[1], [0], [0], [1], [0, 0, 1, 1], [], []>} : vector<128x32xbf16>, vector<32x128xbf16>, vector<128x128xf32> -> vector<128x128xf32>
    %c0_3 = arith.constant 0 : index
    %c0_4 = arith.constant 0 : index
    %4 = vector.load %arg3[%c0_3, %c0_4] : memref<1x128xf32, #tpu.memory_space<vmem>>, vector<1x128xf32>
    %5 = vector.broadcast %4 : vector<1x128xf32> to vector<128x128xf32>
    %6 = arith.addf %3, %5 : vector<128x128xf32>
    %cst_5 = arith.constant 0.000000e+00 : f32
    %7 = vector.broadcast %cst_5 : f32 to vector<128x128xf32>
    %8 = arith.maximumf %6, %7 : vector<128x128xf32>
    %9 = arith.truncf %8 : vector<128x128xf32> to vector<128x128xbf16>
    %c0_6 = arith.constant 0 : index
    %c0_7 = arith.constant 0 : index
    %10 = vector.load %arg4[%c0_6, %c0_7] : memref<128x16xbf16, #tpu.memory_space<vmem>>, vector<128x16xbf16>
    %cst_8 = arith.constant dense<0.000000e+00> : vector<128x16xf32>
    %11 = tpu.matmul %9, %10, %cst_8 {dimension_numbers = #tpu.dot_dimension_numbers<[1], [0], [0], [1], [0, 0, 1, 1], [], []>} : vector<128x128xbf16>, vector<128x16xbf16>, vector<128x16xf32> -> vector<128x16xf32>
    %c0_9 = arith.constant 0 : index
    %c0_10 = arith.constant 0 : index
    %12 = vector.load %arg5[%c0_9, %c0_10] : memref<1x16xf32, #tpu.memory_space<vmem>>, vector<1x16xf32>
    %13 = vector.broadcast %12 : vector<1x16xf32> to vector<128x16xf32>
    %14 = arith.addf %11, %13 : vector<128x16xf32>
    %c0_11 = arith.constant 0 : index
    %c0_12 = arith.constant 0 : index
    %15 = vector.load %arg6[%c0_11, %c0_12] : memref<128x16xf32, #tpu.memory_space<vmem>>, vector<128x16xf32>
    tpu.vector_store %arg6[%c0_11, %c0_12], %14 {strides = array<i32>} : memref<128x16xf32, #tpu.memory_space<vmem>>, vector<128x16xf32>,
    return
  }
  func.func @transform_0(%arg0: i32) -> (i32, i32) {
    %c0_i32 = arith.constant 0 : i32
    %c0_i32_0 = arith.constant 0 : i32
    return %arg0, %c0_i32 : i32, i32
  }
  func.func @transform_1(%arg0: i32) -> (i32, i32) {
    %c0_i32 = arith.constant 0 : i32
    %c0_i32_0 = arith.constant 0 : i32
    %c0_i32_1 = arith.constant 0 : i32
    return %c0_i32, %c0_i32_0 : i32, i32
  }
  func.func @transform_2(%arg0: i32) -> (i32, i32) {
    %c0_i32 = arith.constant 0 : i32
    %c0_i32_0 = arith.constant 0 : i32
    %c0_i32_1 = arith.constant 0 : i32
    return %c0_i32, %c0_i32_0 : i32, i32
  }
  func.func @transform_3(%arg0: i32) -> (i32, i32) {
    %c0_i32 = arith.constant 0 : i32
    %c0_i32_0 = arith.constant 0 : i32
    %c0_i32_1 = arith.constant 0 : i32
    return %c0_i32, %c0_i32_0 : i32, i32
  }
  func.func @transform_4(%arg0: i32) -> (i32, i32) {
    %c0_i32 = arith.constant 0 : i32
    %c0_i32_0 = arith.constant 0 : i32
    %c0_i32_1 = arith.constant 0 : i32
    return %c0_i32, %c0_i32_0 : i32, i32
  }
  func.func @transform_5(%arg0: i32) -> (i32, i32) {
    %c0_i32 = arith.constant 0 : i32
    %c0_i32_0 = arith.constant 0 : i32
    return %arg0, %c0_i32 : i32, i32
  }
}

</mosaic_0001>

<bundles_post_ra>
// kernel: tpu_custom_call.1
= control target key start
LH: loop header
LB: loop body
LE: loop exit
PB: predicated region body
PF: predicated region fallthrough
CT: control target
= control target key end

     0   :  { %vm65_vm0 = vcmask 261120   ;;  %vm280_vm1 = vcmask 130048   ;;  %s557_s1 = inlined_call_operand.vmem [shape: bf16[32,128], index: 1, kind: input, shape index: {}]   ;;  %s558_s0 = inlined_call_operand.vmem [shape: f32[128,32], index: 0, kind: input, shape index: {}]   ;;  %s559_s2 = inlined_call_operand.vmem [shape: f32[1,128], index: 2, kind: input, shape index: {}]   ;;  %s560_s3 = inlined_call_operand.vmem [shape: bf16[128,16], index: 3, kind: input, shape index: {}]   ;;  %s561_s4 = inlined_call_operand.vmem [shape: f32[1,16], index: 4, kind: input, shape index: {}]   ;;  %s562_s5 = inlined_call_operand.vmem [shape: f32[128,16], index: 5, kind: output, shape index: {}]  }
   0x1   :  { %v350_v0 = vld [vmem:[%s557_s1 + $0x8] sm:$0xff]  ;;  %v349_v1 = vld [vmem:[%s557_s1] sm:$0xff]  ;;  %v23_v5 = vld [vmem:[%s558_s0 + $0x10] sm:$0xff] }
   0x2   :  { %96 = vmatpush.bf16.msra.mxu0 %v350_v0  ;;  %v21_v2 = vld [vmem:[%s558_s0] sm:$0xff]  ;;  %v22_v3 = vld [vmem:[%s558_s0 + $0x8] sm:$0xff]  ;;  %359 = vmatpush.bf16.msra.mxu3 %v350_v0  ;;  %v24_v6 = vld [vmem:[%s558_s0 + $0x18] sm:$0xff] }
   0x3   :  { %v37_v4 = vpack.c.bf16 %v22_v3, %v21_v2  ;;  %v38_v7 = vpack.c.bf16 %v24_v6, %v23_v5  ;;  %v25_v8 = vld [vmem:[%s558_s0 + $0x20] sm:$0xff]  ;;  %v26_v9 = vld [vmem:[%s558_s0 + $0x28] sm:$0xff]  ;;  %v31_v11 = vld [vmem:[%s558_s0 + $0x50] sm:$0xff] }
   0x4   :  { %v39_v10 = vpack.c.bf16 %v26_v9, %v25_v8  ;;  %v32_v12 = vld [vmem:[%s558_s0 + $0x58] sm:$0xff]  ;;  %v357_v15 = vld [vmem:[%s560_s3 + $0x30] sm:$0xff]  ;;  %v356_v16 = vld [vmem:[%s560_s3 + $0x28] sm:$0xff] }
   0x5   :  { %v42_v13 = vpack.c.bf16 %v32_v12, %v31_v11  ;;  %v358_v14 = vld [vmem:[%s560_s3 + $0x38] sm:$0xff]  ;;  %v27_v17 = vld [vmem:[%s558_s0 + $0x30] sm:$0xff]  ;;  %v33_v19 = vld [vmem:[%s558_s0 + $0x60] sm:$0xff] }
   0x6   :  { %97 = vmatpush.bf16.msra.mxu0 %v349_v1  ;;  %360 = vmatpush.bf16.msra.mxu3 %v349_v1  ;;  %v28_v18 = vld [vmem:[%s558_s0 + $0x38] sm:$0xff]  ;;  %v34_v20 = vld [vmem:[%s558_s0 + $0x68] sm:$0xff]  ;;  %v355_v22 = vld [vmem:[%s560_s3 + $0x20] sm:$0xff] }
   0x7   :  { %231 = vmatpush.bf16.msra.mxu1 %v358_v14  ;;  %361 = vmatpush.bf16.msra.mxu2 %v358_v14  ;;  %v40_v21 = vpack.c.bf16 %v28_v18, %v27_v17  ;;  %v43_v23 = vpack.c.bf16 %v34_v20, %v33_v19  ;;  %v29_v24 = vld [vmem:[%s558_s0 + $0x40] sm:$0xff]  ;;  %v30_v25 = vld [vmem:[%s558_s0 + $0x48] sm:$0xff]  ;;  %v35_v26 = vld [vmem:[%s558_s0 + $0x70] sm:$0xff] }
   0x8   :  { %v36_v27 = vld [vmem:[%s558_s0 + $0x78] sm:$0xff]  ;;  %v41_v28 = vpack.c.bf16 %v30_v25, %v29_v24  ;;  %v353_v31 = vld [vmem:[%s560_s3 + $0x10] sm:$0xff]  ;;  %v352_v32 = vld [vmem:[%s560_s3 + $0x8] sm:$0xff] }
   0x9   :  { %309 = vmatmul.msk.bf16.vlgmr.msra.gmra.mxu0 %vm65_vm0, %v37_v4  ;;  %314 = vmatmul.msk.bf16.vlgmr.msra.gmra.mxu3 %vm65_vm0, %v42_v13  ;;  %v44_v29 = vpack.c.bf16 %v36_v27, %v35_v26  ;;  %v354_v30 = vld [vmem:[%s560_s3 + $0x18] sm:$0xff]  ;;  %v351_v33 = vld [vmem:[%s560_s3] sm:$0xff] }
   0xa   :  { %v369_v35 = vld [vmem:[%s559_s2] ss:$0 sm:$0xff] }
   0xb   :  { %232 = vmatpush.bf16.msra.mxu1 %v357_v15  ;;  %362 = vmatpush.bf16.msra.mxu2 %v357_v15  ;;  %v370_v27 = vld [vmem:[%s561_s4] ss:$0 sm:$0xff] }
   0xf   :  { %233 = vmatpush.bf16.msra.mxu1 %v356_v16  ;;  %363 = vmatpush.bf16.msra.mxu2 %v356_v16 }
  0x13   :  { %234 = vmatpush.bf16.msra.mxu1 %v355_v22  ;;  %364 = vmatpush.bf16.msra.mxu2 %v355_v22 }
  0x17   :  { %235 = vmatpush.bf16.msra.mxu1 %v354_v30  ;;  %365 = vmatpush.bf16.msra.mxu2 %v354_v30 }
  0x19   :  { %310 = vmatmul.msk.bf16.gmra.mxu0 %vm65_vm0, %v38_v7  ;;  %315 = vmatmul.msk.bf16.gmra.mxu3 %vm65_vm0, %v43_v23 }
  0x1b   :  { %236 = vmatpush.bf16.msra.mxu1 %v353_v31  ;;  %366 = vmatpush.bf16.msra.mxu2 %v353_v31 }
  0x1f   :  { %237 = vmatpush.bf16.msra.mxu1 %v352_v32  ;;  %367 = vmatpush.bf16.msra.mxu2 %v352_v32 }
  0x23   :  { %238 = vmatpush.bf16.msra.mxu1 %v351_v33  ;;  %368 = vmatpush.bf16.msra.mxu2 %v351_v33 }
  0x29   :  { %311 = vmatmul.msk.bf16.gmra.mxu0 %vm65_vm0, %v39_v10  ;;  %316 = vmatmul.msk.bf16.gmra.mxu3 %vm65_vm0, %v44_v29 }
  0x39   :  { %312 = vmatmul.msk.bf16.gmra.mxu0 %vm65_vm0, %v40_v21 }
  0x49   :  { %313 = vmatmul.msk.bf16.gmra.mxu0 %vm65_vm0, %v41_v28 }
  0x86   :  { %v99_v34 = vpop.f32.mrf.mxu0 }
  0x87   :  { %v100_v36 = vadd.f32 %v369_v35, %v99_v34 }
  0x89   :  { %v139_v39 = vmax.f32 %v100_v36, 0.0 }
  0x8c   :  { %v124_v0 = vpop.f32.mrf.mxu3 }
  0x8d   :  { %v125_v9 = vadd.f32 %v369_v35, %v124_v0 }
  0x8e   :  { %v101_v37 = vpop.f32.mrf.mxu0 }
  0x8f   :  { %v102_v38 = vadd.f32 %v369_v35, %v101_v37  ;;  %v149_v11 = vmax.f32 %v125_v9, 0.0 }
  0x91   :  { %v140_v40 = vmax.f32 %v102_v38, 0.0 }
  0x93   :  { %v155_v41 = vpack.c.bf16 %v140_v40, %v139_v39 }
  0x94   :  { %v126_v4 = vpop.f32.mrf.mxu3 }
  0x95   :  { %239 = vmatmul.bf16.vlgmr.msra.gmra.mxu1 %v155_v41  ;;  %v127_v10 = vadd.f32 %v369_v35, %v126_v4 }
  0x96   :  { %v104_v42 = vpop.f32.mrf.mxu0 }
  0x97   :  { %v105_v43 = vadd.f32 %v369_v35, %v104_v42  ;;  %v150_v12 = vmax.f32 %v127_v10, 0.0 }
  0x99   :  { %v141_v46 = vmax.f32 %v105_v43, 0.0  ;;  %v160_v13 = vpack.c.bf16 %v150_v12, %v149_v11 }
  0x9c   :  { %v129_v8 = vpop.f32.mrf.mxu3 }
  0x9d   :  { %v130_v15 = vadd.f32 %v369_v35, %v129_v8 }
  0x9e   :  { %v106_v44 = vpop.f32.mrf.mxu0 }
  0x9f   :  { %v107_v45 = vadd.f32 %v369_v35, %v106_v44  ;;  %v151_v18 = vmax.f32 %v130_v15, 0.0 }
  0xa1   :  { %v142_v47 = vmax.f32 %v107_v45, 0.0 }
  0xa3   :  { %v156_v48 = vpack.c.bf16 %v142_v47, %v141_v46 }
  0xa4   :  { %v131_v14 = vpop.f32.mrf.mxu3 }
  0xa5   :  { %244 = vmatmul.bf16.gmra.mxu1 %v156_v48  ;;  %v132_v16 = vadd.f32 %v369_v35, %v131_v14 }
  0xa6   :  { %v109_v49 = vpop.f32.mrf.mxu0 }
  0xa7   :  { %v110_v50 = vadd.f32 %v369_v35, %v109_v49  ;;  %v152_v19 = vmax.f32 %v132_v16, 0.0 }
  0xa9   :  { %v143_v53 = vmax.f32 %v110_v50, 0.0  ;;  %v161_v20 = vpack.c.bf16 %v152_v19, %v151_v18 }
  0xac   :  { %v134_v17 = vpop.f32.mrf.mxu3 }
  0xad   :  { %v135_v22 = vadd.f32 %v369_v35, %v134_v17 }
  0xae   :  { %v111_v51 = vpop.f32.mrf.mxu0 }
  0xaf   :  { %v112_v52 = vadd.f32 %v369_v35, %v111_v51  ;;  %v153_v24 = vmax.f32 %v135_v22, 0.0 }
  0xb1   :  { %v144_v54 = vmax.f32 %v112_v52, 0.0 }
  0xb3   :  { %v157_v55 = vpack.c.bf16 %v144_v54, %v143_v53 }
  0xb4   :  { %v136_v21 = vpop.f32.mrf.mxu3 }
  0xb5   :  { %249 = vmatmul.bf16.gmra.mxu1 %v157_v55  ;;  %v137_v23 = vadd.f32 %v369_v35, %v136_v21 }
  0xb6   :  { %v114_v56 = vpop.f32.mrf.mxu0 }
  0xb7   :  { %v115_v57 = vadd.f32 %v369_v35, %v114_v56  ;;  %v154_v25 = vmax.f32 %v137_v23, 0.0 }
  0xb9   :  { %v145_v60 = vmax.f32 %v115_v57, 0.0  ;;  %v162_v26 = vpack.c.bf16 %v154_v25, %v153_v24 }
  0xbe   :  { %v116_v58 = vpop.f32.mrf.mxu0 }
  0xbf   :  { %v117_v59 = vadd.f32 %v369_v35, %v116_v58 }
  0xc1   :  { %v146_v61 = vmax.f32 %v117_v59, 0.0 }
  0xc3   :  { %v158_v62 = vpack.c.bf16 %v146_v61, %v145_v60 }
  0xc5   :  { %254 = vmatmul.bf16.gmra.mxu1 %v158_v62 }
  0xc6   :  { %v119_v63 = vpop.f32.mrf.mxu0 }
  0xc7   :  { %v120_v1 = vadd.f32 %v369_v35, %v119_v63 }
  0xc9   :  { %v147_v5 = vmax.f32 %v120_v1, 0.0 }
  0xce   :  { %v121_v2 = vpop.f32.mrf.mxu0 }
  0xcf   :  { %v122_v3 = vadd.f32 %v369_v35, %v121_v2 }
  0xd1   :  { %v148_v6 = vmax.f32 %v122_v3, 0.0 }
  0xd3   :  { %v159_v7 = vpack.c.bf16 %v148_v6, %v147_v5 }
  0xd5   :  { %259 = vmatmul.bf16.vlgmr.msra.gmra.mxu2 %v159_v7 }
  0xe5   :  { %264 = vmatmul.bf16.gmra.mxu2 %v160_v13 }
  0xf5   :  { %269 = vmatmul.bf16.gmra.mxu2 %v161_v20 }
 0x105   :  { %274 = vmatmul.bf16.gmra.mxu2 %v162_v26 }
 0x112   :  { %v240_v28 = vpop.f32.mrf.mxu1 }
 0x113   :  { %v241_v29 = vadd.f32 %v370_v27, %v240_v28 }
 0x115   :  { %281 = vst.msk [vmem:[%s562_s5] sm:$0xff] %vm280_vm1, %v241_v29 }
 0x11a   :  { %v242_v30 = vpop.f32.mrf.mxu1 }
 0x11b   :  { %v243_v31 = vadd.f32 %v370_v27, %v242_v30 }
 0x11d   :  { %282 = vst.msk [vmem:[%s562_s5 + $0x8] sm:$0xff] %vm280_vm1, %v243_v31 }
 0x122   :  { %v245_v32 = vpop.f32.mrf.mxu1 }
 0x123   :  { %v246_v33 = vadd.f32 %v370_v27, %v245_v32 }
 0x125   :  { %283 = vst.msk [vmem:[%s562_s5 + $0x10] sm:$0xff] %vm280_vm1, %v246_v33 }
 0x12a   :  { %v247_v34 = vpop.f32.mrf.mxu1 }
 0x12b   :  { %v248_v35 = vadd.f32 %v370_v27, %v247_v34 }
 0x12d   :  { %284 = vst.msk [vmem:[%s562_s5 + $0x18] sm:$0xff] %vm280_vm1, %v248_v35 }
 0x132   :  { %v250_v36 = vpop.f32.mrf.mxu1 }
 0x133   :  { %v251_v37 = vadd.f32 %v370_v27, %v250_v36 }
 0x135   :  { %285 = vst.msk [vmem:[%s562_s5 + $0x20] sm:$0xff] %vm280_vm1, %v251_v37 }
 0x13a   :  { %v252_v38 = vpop.f32.mrf.mxu1 }
 0x13b   :  { %v253_v39 = vadd.f32 %v370_v27, %v252_v38 }
 0x13d   :  { %286 = vst.msk [vmem:[%s562_s5 + $0x28] sm:$0xff] %vm280_vm1, %v253_v39 }
 0x142   :  { %v255_v40 = vpop.f32.mrf.mxu1 }
 0x143   :  { %v256_v41 = vadd.f32 %v370_v27, %v255_v40 }
 0x145   :  { %287 = vst.msk [vmem:[%s562_s5 + $0x30] sm:$0xff] %vm280_vm1, %v256_v41 }
 0x14a   :  { %v257_v42 = vpop.f32.mrf.mxu1 }
 0x14b   :  { %v258_v43 = vadd.f32 %v370_v27, %v257_v42 }
 0x14d   :  { %288 = vst.msk [vmem:[%s562_s5 + $0x38] sm:$0xff] %vm280_vm1, %v258_v43 }
 0x158   :  { %v260_v44 = vpop.f32.mrf.mxu2 }
 0x159   :  { %v261_v45 = vadd.f32 %v370_v27, %v260_v44 }
 0x15b   :  { %289 = vst.msk [vmem:[%s562_s5 + $0x40] sm:$0xff] %vm280_vm1, %v261_v45 }
 0x160   :  { %v262_v46 = vpop.f32.mrf.mxu2 }
 0x161   :  { %v263_v47 = vadd.f32 %v370_v27, %v262_v46 }
 0x163   :  { %290 = vst.msk [vmem:[%s562_s5 + $0x48] sm:$0xff] %vm280_vm1, %v263_v47 }
 0x168   :  { %v265_v48 = vpop.f32.mrf.mxu2 }
 0x169   :  { %v266_v49 = vadd.f32 %v370_v27, %v265_v48 }
 0x16b   :  { %291 = vst.msk [vmem:[%s562_s5 + $0x50] sm:$0xff] %vm280_vm1, %v266_v49 }
 0x170   :  { %v267_v50 = vpop.f32.mrf.mxu2 }
 0x171   :  { %v268_v51 = vadd.f32 %v370_v27, %v267_v50 }
 0x173   :  { %292 = vst.msk [vmem:[%s562_s5 + $0x58] sm:$0xff] %vm280_vm1, %v268_v51 }
 0x178   :  { %v270_v52 = vpop.f32.mrf.mxu2 }
 0x179   :  { %v271_v53 = vadd.f32 %v370_v27, %v270_v52 }
 0x17b   :  { %293 = vst.msk [vmem:[%s562_s5 + $0x60] sm:$0xff] %vm280_vm1, %v271_v53 }
 0x180   :  { %v272_v54 = vpop.f32.mrf.mxu2 }
 0x181   :  { %v273_v55 = vadd.f32 %v370_v27, %v272_v54 }
 0x183   :  { %294 = vst.msk [vmem:[%s562_s5 + $0x68] sm:$0xff] %vm280_vm1, %v273_v55 }
 0x188   :  { %v275_v56 = vpop.f32.mrf.mxu2 }
 0x189   :  { %v276_v57 = vadd.f32 %v370_v27, %v275_v56 }
 0x18b   :  { %295 = vst.msk [vmem:[%s562_s5 + $0x70] sm:$0xff] %vm280_vm1, %v276_v57 }
 0x190   :  { %v277_v58 = vpop.f32.mrf.mxu2 }
 0x191   :  { %v278_v59 = vadd.f32 %v370_v27, %v277_v58 }
 0x193   :  { %296 = vst.msk [vmem:[%s562_s5 + $0x78] sm:$0xff] %vm280_vm1, %v278_v59 }

</bundles_post_ra>
